<compile_context>
chip_gen: v7x
topology: tpu7x:2x2x1
jax: 0.10.0
libtpu: 0.0.40
codegen_flags: <defaults>
</compile_context>

<pallas_src>
import functools

import jax
import jax.numpy as jnp
from jax.experimental import pallas as pl
from jax.experimental.pallas import tpu as pltpu


def _round_up(x, m):
    return ((x + m - 1) // m) * m


def _distill_kl_kernel(ys_ref, yt_ref, noise_ref, o_ref, acc_ref, *,
                       T, global_B, tile_b):
    i = pl.program_id(0)
    n_tiles = pl.num_programs(0)

    @pl.when(i == 0)
    def _():
        acc_ref[...] = jnp.zeros_like(acc_ref)

    inv_T = 1.0 / T
    ys = ys_ref[...].astype(jnp.float32) * inv_T      # student logits / T
    yt = yt_ref[...].astype(jnp.float32) * inv_T      # teacher logits / T

    # Student log-softmax over the class (lane) axis.
    s_shift = ys - jnp.max(ys, axis=-1, keepdims=True)
    log_p_s = s_shift - jnp.log(jnp.sum(jnp.exp(s_shift), axis=-1, keepdims=True))

    # Hoisted teacher scalings shared by the three synthetic teachers.
    yt_scaled = yt * 0.9
    noise_scale = 0.1 * inv_T

    def kl_row_sums(z):
        # z = teacher_logits / T ; returns per-row KL(softmax(z) || p_s), (tb, 1).
        z_shift = z - jnp.max(z, axis=-1, keepdims=True)
        e = jnp.exp(z_shift)
        denom = jnp.sum(e, axis=-1, keepdims=True)
        p = e / denom                       # exact reciprocal: keeps sum(p) == 1
        log_p = z_shift - jnp.log(denom)
        return jnp.sum(p * (log_p - log_p_s), axis=-1, keepdims=True)

    row_kl = kl_row_sums(yt)
    synth = None
    for j in range(3):
        nj = noise_ref[j].astype(jnp.float32)
        term = kl_row_sums(nj * noise_scale + yt_scaled)
        synth = term if synth is None else synth + term
    row_kl = row_kl + 0.8 * synth

    # Mask padded batch rows (last tile may hang past B); accumulate per-row so
    # the cross-sublane reduce is deferred to the final tile.
    row0 = i * tile_b
    row_ids = jax.lax.broadcasted_iota(jnp.int32, row_kl.shape, 0) + row0
    acc_ref[...] += jnp.where(row_ids < global_B, row_kl, 0.0)

    @pl.when(i == n_tiles - 1)
    def _():
        scale = (T * T) / float(global_B)     # global batch size, NOT tile size
        total = jnp.sum(acc_ref[...]) * scale
        o_ref[...] = jnp.broadcast_to(total, o_ref.shape).astype(jnp.float32)


def _vmem_limit_bytes():
    cap = 128 * 1024 * 1024
    try:
        info = pltpu.get_tpu_info()
        cap = int(getattr(info, "vmem_capacity_bytes", cap))
    except Exception:
        pass
    # ~40 MiB on 64 MiB parts (v7x), ~80 MiB (capped 96) on 128 MiB parts (v5e/v6e).
    return int(min(cap * 5 // 8, 96 * 1024 * 1024))


def _choose_tile_b(B, C, sublane_mult, vmem_limit):
    # ~18 concurrently-live f32 (tb, C) slabs: 2x double-buffered logit inputs,
    # 3x double-buffered noise slices, plus softmax/KL temporaries.  Leave half
    # the limit as headroom for compiler scratch / output buffers.
    budget = vmem_limit // 2
    per_row = 18 * C * 4
    tb = max(sublane_mult, (budget // per_row) // sublane_mult * sublane_mult)
    tb = min(tb, 4096, _round_up(B, sublane_mult))
    return int(tb)


def distill_kl(y_s, y_t, target=None, *, T, noise=None, seed=0):
    """Pallas implementation of DistillKL.forward.

    `target` is accepted for API parity with the PyTorch module but is unused
    (as in the reference forward).  `noise` may be passed as a (3, B, C)
    array of N(0,1) draws (like torch.randn in the reference); if omitted it
    is generated from `seed`.  Inputs may be f32 or bf16; math runs in f32.
    """
    del target
    B, C = y_s.shape
    if noise is None:
        noise = jax.random.normal(jax.random.PRNGKey(seed), (3, B, C),
                                  dtype=jnp.float32)

    # Sublane multiple depends on narrowest input dtype ((16,128) min tile for bf16).
    sublane_mult = 8
    for a in (y_s, y_t):
        if a.dtype.itemsize == 2:
            sublane_mult = max(sublane_mult, 16)
        elif a.dtype.itemsize == 1:
            sublane_mult = max(sublane_mult, 32)

    vmem_limit = _vmem_limit_bytes()
    tb = _choose_tile_b(B, C, sublane_mult, vmem_limit)
    n_tiles = pl.cdiv(B, tb)

    logits_spec = pl.BlockSpec((tb, C), lambda i: (i, 0))
    noise_spec = pl.BlockSpec((3, tb, C), lambda i: (0, i, 0))
    out_spec = pl.BlockSpec((8, 128), lambda i: (0, 0))     # lane-dense output slab

    kernel = functools.partial(_distill_kl_kernel, T=float(T), global_B=B,
                               tile_b=tb)

    out = pl.pallas_call(
        kernel,
        grid_spec=pltpu.PrefetchScalarGridSpec(
            num_scalar_prefetch=0,
            grid=(n_tiles,),
            in_specs=[logits_spec, logits_spec, noise_spec],
            out_specs=out_spec,
            scratch_shapes=[pltpu.VMEM((tb, 1), jnp.float32)],
        ),
        out_shape=jax.ShapeDtypeStruct((8, 128), jnp.float32),
        compiler_params=pltpu.CompilerParams(
            dimension_semantics=("arbitrary",),
            vmem_limit_bytes=vmem_limit,
        ),
    )(y_s, y_t, noise)

    return out[0, 0]


def _reference(y_s, y_t, noise, T):
    """Pure-JAX reference (same noise draws) for correctness checking."""
    log_p_s = jax.nn.log_softmax(y_s / T, axis=1)

    def klsum(teacher_logits):
        p = jax.nn.softmax(teacher_logits / T, axis=1)
        log_p = jax.nn.log_softmax(teacher_logits / T, axis=1)
        return jnp.sum(p * (log_p - log_p_s))

    B = y_s.shape[0]
    scale = T * T / B
    synth = sum(klsum(noise[j] * 0.1 + y_t * 0.9) for j in range(3))
    return klsum(y_t) * scale + 0.8 * synth * scale


if __name__ == "__main__":
    key = jax.random.PRNGKey(0)
    k_s, k_t, k_n, k_tgt = jax.random.split(key, 4)

    B, C = 8, 32            # batch of 8, 32-way classification logits
    T = 4.0                 # distillation temperature

    y_s = jax.random.normal(k_s, (B, C), dtype=jnp.float32)
    y_t = jax.random.normal(k_t, (B, C), dtype=jnp.float32)
    target = jax.random.randint(k_tgt, (B,), 0, C)   # unused, API parity
    noise = jax.random.normal(k_n, (3, B, C), dtype=jnp.float32)

    loss = distill_kl(y_s, y_t, target, T=T, noise=noise)
    loss = jax.block_until_ready(loss)

    ref = _reference(y_s, y_t, noise, T)
    assert jnp.allclose(loss, ref, rtol=1e-3, atol=1e-5), (float(loss), float(ref))

    print("KERNEL_OK")
</pallas_src>

<mosaic_0001>
module attributes {stable_mosaic.version = 11 : i64} {
  func.func @_distill_kl_kernel(%arg0: i32, %arg1: memref<8x32xf32, #tpu.memory_space<vmem>>, %arg2: memref<8x32xf32, #tpu.memory_space<vmem>>, %arg3: memref<3x8x32xf32, #tpu.memory_space<vmem>>, %arg4: memref<8x128xf32, #tpu.memory_space<vmem>>, %arg5: memref<8x1xf32, #tpu.memory_space<vmem>>) attributes {dimension_semantics = [#tpu.dimension_semantics<arbitrary>], iteration_bounds = array<i64: 1>, scalar_prefetch = 0 : i64, scratch_operands = 1 : i64, tpu.core_type = #tpu.core_type<tc>, window_params = [{transform_indices = @transform_0, window_bounds = array<i64: 8, 32>}, {transform_indices = @transform_1, window_bounds = array<i64: 8, 32>}, {transform_indices = @transform_2, window_bounds = array<i64: 3, 8, 32>}, {pipeline_mode = #tpu.pipeline_mode<synchronous>, transform_indices = @transform_3, window_bounds = array<i64: 8, 128>}]} {
    %c0_i32 = arith.constant 0 : i32
    %0 = arith.cmpi eq, %arg0, %c0_i32 : i32
    %1 = arith.extui %0 : i1 to i32
    %c0_i32_0 = arith.constant 0 : i32
    %2 = arith.cmpi ne, %1, %c0_i32_0 : i32
    scf.if %2 {
      %cst_39 = arith.constant 0.000000e+00 : f32
      %119 = vector.broadcast %cst_39 : f32 to vector<8x1xf32>
      %c0_40 = arith.constant 0 : index
      %c0_41 = arith.constant 0 : index
      %120 = vector.load %arg5[%c0_40, %c0_41] : memref<8x1xf32, #tpu.memory_space<vmem>>, vector<8x1xf32>
      tpu.vector_store %arg5[%c0_40, %c0_41], %119 {strides = array<i32>} : memref<8x1xf32, #tpu.memory_space<vmem>>, vector<8x1xf32>,
    } else {
    }
    %c0 = arith.constant 0 : index
    %c0_1 = arith.constant 0 : index
    %3 = vector.load %arg1[%c0, %c0_1] : memref<8x32xf32, #tpu.memory_space<vmem>>, vector<8x32xf32>
    %cst = arith.constant 2.500000e-01 : f32
    %4 = vector.broadcast %cst : f32 to vector<8x32xf32>
    %5 = arith.mulf %3, %4 : vector<8x32xf32>
    %c0_2 = arith.constant 0 : index
    %c0_3 = arith.constant 0 : index
    %6 = vector.load %arg2[%c0_2, %c0_3] : memref<8x32xf32, #tpu.memory_space<vmem>>, vector<8x32xf32>
    %cst_4 = arith.constant 2.500000e-01 : f32
    %7 = vector.broadcast %cst_4 : f32 to vector<8x32xf32>
    %8 = arith.mulf %6, %7 : vector<8x32xf32>
    %cst_5 = arith.constant dense<0xFF800000> : vector<8xf32>
    %9 = vector.multi_reduction <maximumf>, %5, %cst_5 [1] : vector<8x32xf32> to vector<8xf32>
    %10 = vector.shape_cast %9 : vector<8xf32> to vector<8x1xf32>
    %11 = vector.broadcast %10 : vector<8x1xf32> to vector<8x32xf32>
    %12 = arith.subf %5, %11 : vector<8x32xf32>
    %13 = math.exp %12 : vector<8x32xf32>
    %cst_6 = arith.constant dense<0.000000e+00> : vector<8xf32>
    %14 = vector.multi_reduction <add>, %13, %cst_6 [1] : vector<8x32xf32> to vector<8xf32>
    %15 = vector.shape_cast %14 : vector<8xf32> to vector<8x1xf32>
    %16 = math.log %15 : vector<8x1xf32>
    %17 = vector.broadcast %16 : vector<8x1xf32> to vector<8x32xf32>
    %18 = arith.subf %12, %17 : vector<8x32xf32>
    %cst_7 = arith.constant 0.899999976 : f32
    %19 = vector.broadcast %cst_7 : f32 to vector<8x32xf32>
    %20 = arith.mulf %8, %19 : vector<8x32xf32>
    %cst_8 = arith.constant dense<0xFF800000> : vector<8xf32>
    %21 = vector.multi_reduction <maximumf>, %8, %cst_8 [1] : vector<8x32xf32> to vector<8xf32>
    %22 = vector.shape_cast %21 : vector<8xf32> to vector<8x1xf32>
    %23 = vector.broadcast %22 : vector<8x1xf32> to vector<8x32xf32>
    %24 = arith.subf %8, %23 : vector<8x32xf32>
    %25 = math.exp %24 : vector<8x32xf32>
    %cst_9 = arith.constant dense<0.000000e+00> : vector<8xf32>
    %26 = vector.multi_reduction <add>, %25, %cst_9 [1] : vector<8x32xf32> to vector<8xf32>
    %27 = vector.shape_cast %26 : vector<8xf32> to vector<8x1xf32>
    %28 = vector.broadcast %27 : vector<8x1xf32> to vector<8x32xf32>
    %29 = arith.divf %25, %28 : vector<8x32xf32>
    %30 = math.log %27 : vector<8x1xf32>
    %31 = vector.broadcast %30 : vector<8x1xf32> to vector<8x32xf32>
    %32 = arith.subf %24, %31 : vector<8x32xf32>
    %33 = arith.subf %32, %18 : vector<8x32xf32>
    %34 = arith.mulf %29, %33 : vector<8x32xf32>
    %cst_10 = arith.constant dense<0.000000e+00> : vector<8xf32>
    %35 = vector.multi_reduction <add>, %34, %cst_10 [1] : vector<8x32xf32> to vector<8xf32>
    %36 = vector.shape_cast %35 : vector<8xf32> to vector<8x1xf32>
    %c0_11 = arith.constant 0 : index
    %c0_12 = arith.constant 0 : index
    %c0_13 = arith.constant 0 : index
    %37 = vector.load %arg3[%c0_11, %c0_12, %c0_13] : memref<3x8x32xf32, #tpu.memory_space<vmem>>, vector<1x8x32xf32>
    %38 = vector.shape_cast %37 : vector<1x8x32xf32> to vector<8x32xf32>
    %cst_14 = arith.constant 2.500000e-02 : f32
    %39 = vector.broadcast %cst_14 : f32 to vector<8x32xf32>
    %40 = arith.mulf %38, %39 : vector<8x32xf32>
    %41 = arith.addf %40, %20 : vector<8x32xf32>
    %cst_15 = arith.constant dense<0xFF800000> : vector<8xf32>
    %42 = vector.multi_reduction <maximumf>, %41, %cst_15 [1] : vector<8x32xf32> to vector<8xf32>
    %43 = vector.shape_cast %42 : vector<8xf32> to vector<8x1xf32>
    %44 = vector.broadcast %43 : vector<8x1xf32> to vector<8x32xf32>
    %45 = arith.subf %41, %44 : vector<8x32xf32>
    %46 = math.exp %45 : vector<8x32xf32>
    %cst_16 = arith.constant dense<0.000000e+00> : vector<8xf32>
    %47 = vector.multi_reduction <add>, %46, %cst_16 [1] : vector<8x32xf32> to vector<8xf32>
    %48 = vector.shape_cast %47 : vector<8xf32> to vector<8x1xf32>
    %49 = vector.broadcast %48 : vector<8x1xf32> to vector<8x32xf32>
    %50 = arith.divf %46, %49 : vector<8x32xf32>
    %51 = math.log %48 : vector<8x1xf32>
    %52 = vector.broadcast %51 : vector<8x1xf32> to vector<8x32xf32>
    %53 = arith.subf %45, %52 : vector<8x32xf32>
    %54 = arith.subf %53, %18 : vector<8x32xf32>
    %55 = arith.mulf %50, %54 : vector<8x32xf32>
    %cst_17 = arith.constant dense<0.000000e+00> : vector<8xf32>
    %56 = vector.multi_reduction <add>, %55, %cst_17 [1] : vector<8x32xf32> to vector<8xf32>
    %57 = vector.shape_cast %56 : vector<8xf32> to vector<8x1xf32>
    %c1 = arith.constant 1 : index
    %c0_18 = arith.constant 0 : index
    %c0_19 = arith.constant 0 : index
    %58 = vector.load %arg3[%c1, %c0_18, %c0_19] : memref<3x8x32xf32, #tpu.memory_space<vmem>>, vector<1x8x32xf32>
    %59 = vector.shape_cast %58 : vector<1x8x32xf32> to vector<8x32xf32>
    %cst_20 = arith.constant 2.500000e-02 : f32
    %60 = vector.broadcast %cst_20 : f32 to vector<8x32xf32>
    %61 = arith.mulf %59, %60 : vector<8x32xf32>
    %62 = arith.addf %61, %20 : vector<8x32xf32>
    %cst_21 = arith.constant dense<0xFF800000> : vector<8xf32>
    %63 = vector.multi_reduction <maximumf>, %62, %cst_21 [1] : vector<8x32xf32> to vector<8xf32>
    %64 = vector.shape_cast %63 : vector<8xf32> to vector<8x1xf32>
    %65 = vector.broadcast %64 : vector<8x1xf32> to vector<8x32xf32>
    %66 = arith.subf %62, %65 : vector<8x32xf32>
    %67 = math.exp %66 : vector<8x32xf32>
    %cst_22 = arith.constant dense<0.000000e+00> : vector<8xf32>
    %68 = vector.multi_reduction <add>, %67, %cst_22 [1] : vector<8x32xf32> to vector<8xf32>
    %69 = vector.shape_cast %68 : vector<8xf32> to vector<8x1xf32>
    %70 = vector.broadcast %69 : vector<8x1xf32> to vector<8x32xf32>
    %71 = arith.divf %67, %70 : vector<8x32xf32>
    %72 = math.log %69 : vector<8x1xf32>
    %73 = vector.broadcast %72 : vector<8x1xf32> to vector<8x32xf32>
    %74 = arith.subf %66, %73 : vector<8x32xf32>
    %75 = arith.subf %74, %18 : vector<8x32xf32>
    %76 = arith.mulf %71, %75 : vector<8x32xf32>
    %cst_23 = arith.constant dense<0.000000e+00> : vector<8xf32>
    %77 = vector.multi_reduction <add>, %76, %cst_23 [1] : vector<8x32xf32> to vector<8xf32>
    %78 = vector.shape_cast %77 : vector<8xf32> to vector<8x1xf32>
    %79 = arith.addf %57, %78 : vector<8x1xf32>
    %c2 = arith.constant 2 : index
    %c0_24 = arith.constant 0 : index
    %c0_25 = arith.constant 0 : index
    %80 = vector.load %arg3[%c2, %c0_24, %c0_25] : memref<3x8x32xf32, #tpu.memory_space<vmem>>, vector<1x8x32xf32>
    %81 = vector.shape_cast %80 : vector<1x8x32xf32> to vector<8x32xf32>
    %cst_26 = arith.constant 2.500000e-02 : f32
    %82 = vector.broadcast %cst_26 : f32 to vector<8x32xf32>
    %83 = arith.mulf %81, %82 : vector<8x32xf32>
    %84 = arith.addf %83, %20 : vector<8x32xf32>
    %cst_27 = arith.constant dense<0xFF800000> : vector<8xf32>
    %85 = vector.multi_reduction <maximumf>, %84, %cst_27 [1] : vector<8x32xf32> to vector<8xf32>
    %86 = vector.shape_cast %85 : vector<8xf32> to vector<8x1xf32>
    %87 = vector.broadcast %86 : vector<8x1xf32> to vector<8x32xf32>
    %88 = arith.subf %84, %87 : vector<8x32xf32>
    %89 = math.exp %88 : vector<8x32xf32>
    %cst_28 = arith.constant dense<0.000000e+00> : vector<8xf32>
    %90 = vector.multi_reduction <add>, %89, %cst_28 [1] : vector<8x32xf32> to vector<8xf32>
    %91 = vector.shape_cast %90 : vector<8xf32> to vector<8x1xf32>
    %92 = vector.broadcast %91 : vector<8x1xf32> to vector<8x32xf32>
    %93 = arith.divf %89, %92 : vector<8x32xf32>
    %94 = math.log %91 : vector<8x1xf32>
    %95 = vector.broadcast %94 : vector<8x1xf32> to vector<8x32xf32>
    %96 = arith.subf %88, %95 : vector<8x32xf32>
    %97 = arith.subf %96, %18 : vector<8x32xf32>
    %98 = arith.mulf %93, %97 : vector<8x32xf32>
    %cst_29 = arith.constant dense<0.000000e+00> : vector<8xf32>
    %99 = vector.multi_reduction <add>, %98, %cst_29 [1] : vector<8x32xf32> to vector<8xf32>
    %100 = vector.shape_cast %99 : vector<8xf32> to vector<8x1xf32>
    %101 = arith.addf %79, %100 : vector<8x1xf32>
    %cst_30 = arith.constant 8.000000e-01 : f32
    %102 = vector.broadcast %cst_30 : f32 to vector<8x1xf32>
    %103 = arith.mulf %102, %101 : vector<8x1xf32>
    %104 = arith.addf %36, %103 : vector<8x1xf32>
    %c8_i32 = arith.constant 8 : i32
    %105 = arith.muli %arg0, %c8_i32 : i32
    %106 = tpu.iota {dimensions = array<i32: 0>} : vector<8x1xi32>
    %107 = vector.broadcast %105 : i32 to vector<8x1xi32>
    %108 = arith.addi %106, %107 : vector<8x1xi32>
    %c0_31 = arith.constant 0 : index
    %c0_32 = arith.constant 0 : index
    %109 = vector.load %arg5[%c0_31, %c0_32] : memref<8x1xf32, #tpu.memory_space<vmem>>, vector<8x1xf32>
    %c8_i32_33 = arith.constant 8 : i32
    %110 = vector.broadcast %c8_i32_33 : i32 to vector<8x1xi32>
    %111 = arith.cmpi slt, %108, %110 : vector<8x1xi32>
    %cst_34 = arith.constant 0.000000e+00 : f32
    %112 = vector.broadcast %cst_34 : f32 to vector<8x1xf32>
    %113 = arith.select %111, %104, %112 : vector<8x1xi1>, vector<8x1xf32>
    %114 = arith.addf %109, %113 : vector<8x1xf32>
    %c0_35 = arith.constant 0 : index
    %c0_36 = arith.constant 0 : index
    %115 = vector.load %arg5[%c0_35, %c0_36] : memref<8x1xf32, #tpu.memory_space<vmem>>, vector<8x1xf32>
    tpu.vector_store %arg5[%c0_35, %c0_36], %114 {strides = array<i32>} : memref<8x1xf32, #tpu.memory_space<vmem>>, vector<8x1xf32>,
    %c0_i32_37 = arith.constant 0 : i32
    %116 = arith.cmpi eq, %arg0, %c0_i32_37 : i32
    %117 = arith.extui %116 : i1 to i32
    %c0_i32_38 = arith.constant 0 : i32
    %118 = arith.cmpi ne, %117, %c0_i32_38 : i32
    scf.if %118 {
      %c0_39 = arith.constant 0 : index
      %c0_40 = arith.constant 0 : index
      %119 = vector.load %arg5[%c0_39, %c0_40] : memref<8x1xf32, #tpu.memory_space<vmem>>, vector<8x1xf32>
      %120 = vector.shape_cast %119 : vector<8x1xf32> to vector<1x8x1xf32>
      %cst_41 = arith.constant dense<0.000000e+00> : vector<1xf32>
      %121 = vector.multi_reduction <add>, %120, %cst_41 [1, 2] : vector<1x8x1xf32> to vector<1xf32>
      %122 = vector.shape_cast %121 : vector<1xf32> to vector<1x1x1xf32>
      %123 = vector.extract %122[0, 0, 0] : f32 from vector<1x1x1xf32>
      %cst_42 = arith.constant 2.000000e+00 : f32
      %124 = arith.mulf %123, %cst_42 : f32
      %125 = vector.broadcast %124 : f32 to vector<8x128xf32>
      %c0_43 = arith.constant 0 : index
      %c0_44 = arith.constant 0 : index
      %126 = vector.load %arg4[%c0_43, %c0_44] : memref<8x128xf32, #tpu.memory_space<vmem>>, vector<8x128xf32>
      tpu.vector_store %arg4[%c0_43, %c0_44], %125 {strides = array<i32>} : memref<8x128xf32, #tpu.memory_space<vmem>>, vector<8x128xf32>,
    } else {
    }
    return
  }
  func.func @transform_0(%arg0: i32) -> (i32, i32) {
    %c0_i32 = arith.constant 0 : i32
    %c0_i32_0 = arith.constant 0 : i32
    return %arg0, %c0_i32 : i32, i32
  }
  func.func @transform_1(%arg0: i32) -> (i32, i32) {
    %c0_i32 = arith.constant 0 : i32
    %c0_i32_0 = arith.constant 0 : i32
    return %arg0, %c0_i32 : i32, i32
  }
  func.func @transform_2(%arg0: i32) -> (i32, i32, i32) {
    %c0_i32 = arith.constant 0 : i32
    %c0_i32_0 = arith.constant 0 : i32
    %c0_i32_1 = arith.constant 0 : i32
    return %c0_i32, %arg0, %c0_i32_0 : i32, i32, i32
  }
  func.func @transform_3(%arg0: i32) -> (i32, i32) {
    %c0_i32 = arith.constant 0 : i32
    %c0_i32_0 = arith.constant 0 : i32
    %c0_i32_1 = arith.constant 0 : i32
    return %c0_i32, %c0_i32_0 : i32, i32
  }
}

</mosaic_0001>

<bundles_post_ra>
// kernel: tpu_custom_call.1
= control target key start
LH: loop header
LB: loop body
LE: loop exit
PB: predicated region body
PF: predicated region fallthrough
CT: control target
= control target key end

     0   :  { %8 = vsyncpa [#allocation4], 0  ;;  %s439_s0 = inlined_call_operand.hbm [shape: f32[8,32], index: 0, kind: input, shape index: {}]   ;;  %s440_s1 = inlined_call_operand.hbm [shape: f32[8,32], index: 1, kind: input, shape index: {}]   ;;  %s441_s2 = inlined_call_operand.hbm [shape: f32[3,8,32], index: 2, kind: input, shape index: {}]   ;;  %s442_s3 = inlined_call_operand.hbm [shape: f32[8,128], index: 3, kind: output, shape index: {}]  }
   0x1   :  { %9 = vsyncpa [#allocation7], 0 }
   0x2   :  { %10 = vsyncpa [#allocation5], 0  ;;  %s342_s12 = smov [#allocation6]   ;;  %s343_s14 = smov [#allocation3]  }
   0x3   :  { %s27_s13 = sshll.u32 %s342_s12, 4  ;;  %s17_s15 = sshll.u32 %s343_s14, 4  ;;  %s28_s13 = int_to_ptr.vmem [resolvable:$true] %s27_s13  ;;  %s18_s15 = int_to_ptr.vmem [resolvable:$true] %s17_s15 }
   0x4   :  { %s248_s18 = scalar_lea.hbm %s440_s1, 128 }
   0x5   :  { %p249_p0 = scmp.ne.s32.totalorder %s440_s1, %s248_s18  ;;  %p252_p1 = scmp.lt.u32.totalorder %s248_s18, %s440_s1 }
   0x7   :  { %p254_p2 = pnand %p252_p1, %p249_p0 }
   0x9   :  { %257 = shalt.err (!%p254_p2)
}
   0xa   :  { %s258_s23 = scalar_lea.vmem %s28_s13, 128  ;;  %p263_p4 = scmp.lt.s32.totalorder %s28_s13, %s28_s13 }
   0xb   :  { %p259_p3 = scmp.ne.s32.totalorder %s28_s13, %s258_s23  ;;  %p264_p5 = scmp.lt.s32.totalorder %s258_s23, %s258_s23 }
   0xd   :  { %p265_p6 = por %p264_p5, %p263_p4 }
   0xf   :  { %p266_p7 = pnand %p265_p6, %p259_p3 }
  0x11   :  { %269 = shalt.err (!%p266_p7)
}
  0x12   :  { %30 = dma.hbm_to_vmem [thread:$0]  %s440_s1, 128, %s28_s13, [#allocation7]  }
  0x13   :  { %s270_s28 = scalar_lea.hbm %s439_s0, 128 }
  0x14   :  { %p271_p8 = scmp.ne.s32.totalorder %s439_s0, %s270_s28  ;;  %p274_p9 = scmp.lt.u32.totalorder %s270_s28, %s439_s0 }
  0x16   :  { %p276_p10 = pnand %p274_p9, %p271_p8 }
  0x18   :  { %279 = shalt.err (!%p276_p10)
}
  0x19   :  { %s280_s6 = scalar_lea.vmem %s18_s15, 128  ;;  %p285_p12 = scmp.lt.s32.totalorder %s18_s15, %s18_s15 }
  0x1a   :  { %p281_p11 = scmp.ne.s32.totalorder %s18_s15, %s280_s6  ;;  %p286_p13 = scmp.lt.s32.totalorder %s280_s6, %s280_s6 }
  0x1c   :  { %p287_p0 = por %p286_p13, %p285_p12 }
  0x1e   :  { %p288_p1 = pnand %p287_p0, %p281_p11 }
  0x20   :  { %291 = shalt.err (!%p288_p1)
}
  0x21   :  { %20 = dma.hbm_to_vmem [thread:$0]  %s439_s0, 128, %s18_s15, [#allocation4]  }
  0x22   :  { %s344_s8 = smov [#allocation8]   ;;  %s292_s12 = scalar_lea.hbm %s441_s2, 384 }
  0x23   :  { %s36_s9 = sshll.u32 %s344_s8, 4  ;;  %p293_p2 = scmp.ne.s32.totalorder %s441_s2, %s292_s12  ;;  %s37_s9 = int_to_ptr.vmem [resolvable:$true] %s36_s9 }
  0x24   :  { %p296_p3 = scmp.lt.u32.totalorder %s292_s12, %s441_s2 }
  0x26   :  { %p298_p4 = pnand %p296_p3, %p293_p2 }
  0x28   :  { %301 = shalt.err (!%p298_p4)
}
  0x29   :  { %s302_s18 = scalar_lea.vmem %s37_s9, 384  ;;  %p307_p6 = scmp.lt.s32.totalorder %s37_s9, %s37_s9 }
  0x2a   :  { %p303_p5 = scmp.ne.s32.totalorder %s37_s9, %s302_s18  ;;  %p308_p7 = scmp.lt.s32.totalorder %s302_s18, %s302_s18 }
  0x2c   :  { %p309_p8 = por %p308_p7, %p307_p6 }
  0x2e   :  { %p310_p9 = pnand %p309_p8, %p303_p5 }
  0x30   :  { %313 = shalt.err (!%p310_p9)
}
  0x31   :  { %s345_s0 = smov 128   ;;  %s346_s15 = smov 8  }
  0x32   :  { %42 = dma.hbm_to_vmem [thread:$0]  %s441_s2, 384, %s37_s9, [#allocation7], %s345_s0, %s345_s0, %s346_s15  }
  0x33   :  { %336 = dma.done.wait [#allocation4], 128  }
  0x34   :  { %337 = vsyncadd [#allocation4], 4294967168 }
  0x35   :  { %338 = dma.done.wait [#allocation7], 512  }
  0x36   :  { %339 = vsyncadd [#allocation7], 4294966784  ;;  %v58_v0 = vld [vmem:[#allocation3] sm:$0xff]  ;;  %vm62_vm0 = vcmask 261120   ;;  %v60_v1 = vld [vmem:[#allocation6] sm:$0xff]  ;;  %vm56_vm1 = vcmask 7168  }
  0x37   :  { %v118_v2 = vld [vmem:[#allocation8 + $0x8] sm:$0xff]  ;;  %v59_v3 = vmul.f32 0.25, %v58_v0  ;;  %v61_v4 = vmul.f32 0.25, %v60_v1  ;;  %v95_v6 = vld [vmem:[#allocation8] sm:$0xff]  ;;  %v142_v7 = vld [vmem:[#allocation8 + $0x10] sm:$0xff]  ;;  %s348_s2 = smov [#allocation9]  }
  0x38   :  { %v119_v5 = vmul.f32 0.025, %v118_v2  ;;  %v96_v8 = vmul.f32 0.025, %v95_v6  ;;  %v143_v9 = vmul.f32 0.025, %v142_v7 }
  0x39   :  { %v63_v10 = vsel %vm62_vm0, %v59_v3, -inf  ;;  %v75_v11 = vmul.f32 0.9, %v61_v4  ;;  %v76_v18 = vsel %vm62_vm0, %v61_v4, -inf  ;;  %s201_s21 = sshll.u32 %s348_s2, 4  ;;  %s202_s21 = int_to_ptr.vmem [resolvable:$true] %s201_s21 }
  0x3a   :  { %64 = vmax.xlane.f32.xlu0 %v63_v10  ;;  %s314_s24 = scalar_lea.vmem %s202_s21, 128  ;;  %p319_p11 = scmp.lt.s32.totalorder %s202_s21, %s202_s21 }
  0x3b   :  { %v120_v12 = vadd.f32 %v119_v5, %v75_v11  ;;  %v97_v13 = vadd.f32 %v96_v8, %v75_v11  ;;  %v144_v14 = vadd.f32 %v143_v9, %v75_v11  ;;  %p315_p10 = scmp.ne.s32.totalorder %s202_s21, %s314_s24  ;;  %p320_p12 = scmp.lt.s32.totalorder %s314_s24, %s314_s24 }
  0x3d   :  { %v121_v15 = vsel %vm62_vm0, %v120_v12, -inf  ;;  %v98_v16 = vsel %vm62_vm0, %v97_v13, -inf  ;;  %v145_v17 = vsel %vm62_vm0, %v144_v14, -inf  ;;  %p321_p13 = por %p320_p12, %p319_p11 }
  0x3e   :  { %122 = vmax.xlane.f32.xlu1 %v121_v15  ;;  %99 = vmax.xlane.f32.xlu0 %v98_v16 }
  0x3f   :  { %p322_p0 = pnand %p321_p13, %p315_p10 }
  0x42   :  { %146 = vmax.xlane.f32.xlu1 %v145_v17  ;;  %77 = vmax.xlane.f32.xlu0 %v76_v18 }
  0xc7   :  { %v65_v19 = vpop.xlane.xlu0 %64 }
  0xc8   :  { %v66_v20 = vsub.f32 %v59_v3, %v65_v19 }
  0xca   :  { %v67_v21 = vmul.f32 1.442695, %v66_v20 }
  0xcb   :  { %v123_v22 = vpop.xlane.xlu1 %122  ;;  %v100_v23 = vpop.xlane.xlu0 %99 }
  0xcc   :  { %220 = vpow2.f32 %v67_v21  ;;  %v124_v24 = vsub.f32 %v120_v12, %v123_v22  ;;  %v101_v25 = vsub.f32 %v97_v13, %v100_v23 }
  0xce   :  { %v125_v26 = vmul.f32 1.442695, %v124_v24  ;;  %v102_v27 = vmul.f32 1.442695, %v101_v25 }
  0xcf   :  { %v147_v28 = vpop.xlane.xlu1 %146  ;;  %v78_v29 = vpop.xlane.xlu0 %77 }
  0xd0   :  { %222 = vpow2.f32 %v125_v26  ;;  %v410_v30 = vsub.f32 %v144_v14, %v147_v28  ;;  %v412_v31 = vsub.f32 %v61_v4, %v78_v29 }
  0xd1   :  { %224 = vpow2.f32 %v102_v27 }
  0xd2   :  { %v149_v32 = vmul.f32 1.442695, %v410_v30  ;;  %v80_v33 = vmul.f32 1.442695, %v412_v31 }
  0xd4   :  { %226 = vpow2.f32 %v149_v32 }
  0xd5   :  { %228 = vpow2.f32 %v80_v33 }
  0xd6   :  { %v221_v34 = vpop.eup %220 }
  0xd7   :  { %v69_v35 = vsel %vm62_vm0, %v221_v34, 0.0 }
  0xd8   :  { %70 = vadd.xlane.f32.xlu1 %v69_v35 }
  0xda   :  { %v223_v36 = vpop.eup %222 }
  0xdb   :  { %v225_v37 = vpop.eup %224  ;;  %v127_v38 = vsel %vm62_vm0, %v223_v36, 0.0 }
  0xdc   :  { %128 = vadd.xlane.f32.xlu1 %v127_v38  ;;  %v104_v39 = vsel %vm62_vm0, %v225_v37, 0.0 }
  0xdd   :  { %105 = vadd.xlane.f32.xlu0 %v104_v39 }
  0xde   :  { %v227_v40 = vpop.eup %226 }
  0xdf   :  { %v229_v41 = vpop.eup %228  ;;  %v151_v42 = vsel %vm62_vm0, %v227_v40, 0.0 }
  0xe0   :  { %v82_v43 = vsel %vm62_vm0, %v229_v41, 0.0 }
  0xe1   :  { %152 = vadd.xlane.f32.xlu0 %v151_v42  ;;  %83 = vadd.xlane.f32.xlu1 %v82_v43 }
 0x165   :  { %v71_v44 = vpop.xlane.xlu1 %70 }
 0x166   :  { %230 = vlog2.f32 %v71_v44 }
 0x169   :  { %v129_v45 = vpop.xlane.xlu1 %128 }
 0x16a   :  { %v106_v46 = vpop.xlane.xlu0 %105  ;;  %232 = vlog2.f32 %v129_v45 }
 0x16b   :  { %234 = vrcp.f32 %v129_v45 }
 0x16c   :  { %236 = vlog2.f32 %v106_v46 }
 0x16d   :  { %238 = vrcp.f32 %v106_v46 }
 0x16e   :  { %v84_v47 = vpop.xlane.xlu1 %83  ;;  %v153_v48 = vpop.xlane.xlu0 %152 }
 0x16f   :  { %240 = vlog2.f32 %v84_v47 }
 0x170   :  { %v231_v49 = vpop.eup %230  ;;  %242 = vrcp.f32 %v84_v47 }
 0x171   :  { %244 = vlog2.f32 %v153_v48  ;;  %v73_v50 = vmul.f32 0.6931472, %v231_v49 }
 0x172   :  { %246 = vrcp.f32 %v153_v48 }
 0x173   :  { %v74_v55 = vsub.f32 %v66_v20, %v73_v50  ;;  %v347_v20 = vmov 0.0  }
 0x174   :  { %v233_v51 = vpop.eup %232  ;;  %57 = vst.msk [vmem:[#allocation2] sm:$0xff] %vm56_vm1, %v347_v20 }
 0x175   :  { %v235_v52 = vpop.eup %234  ;;  %v133_v53 = vmul.f32 0.6931472, %v233_v51 }
 0x176   :  { %v237_v54 = vpop.eup %236  ;;  %v131_v60 = vmul.f32 %v235_v52, %v223_v36 }
 0x177   :  { %v110_v56 = vmul.f32 0.6931472, %v237_v54  ;;  %v134_v57 = vsub.f32 %v124_v24, %v133_v53  ;;  %v239_v58 = vpop.eup %238 }
 0x178   :  { %v108_v3 = vmul.f32 %v239_v58, %v225_v37 }
 0x179   :  { %v241_v59 = vpop.eup %240  ;;  %v135_v61 = vsub.f32 %v134_v57, %v74_v55  ;;  %v111_v62 = vsub.f32 %v101_v25, %v110_v56 }
 0x17a   :  { %v243_v63 = vpop.eup %242  ;;  %v88_v0 = vmul.f32 0.6931472, %v241_v59 }
 0x17b   :  { %v245_v1 = vpop.eup %244  ;;  %v136_v2 = vmul.f32 %v135_v61, %v131_v60  ;;  %v112_v4 = vsub.f32 %v111_v62, %v74_v55  ;;  %v86_v10 = vmul.f32 %v243_v63, %v229_v41  ;;  %v172_v28 = vld [vmem:[#allocation2] sm:$0xff] }
 0x17c   :  { %v157_v5 = vmul.f32 0.6931472, %v245_v1  ;;  %v89_v6 = vsub.f32 %v412_v31, %v88_v0  ;;  %v247_v7 = vpop.eup %246 }
 0x17d   :  { %v137_v8 = vsel %vm62_vm0, %v136_v2, 0.0  ;;  %v113_v9 = vmul.f32 %v112_v4, %v108_v3  ;;  %v155_v15 = vmul.f32 %v247_v7, %v227_v40 }
 0x17e   :  { %138 = vadd.xlane.f32.xlu1 %v137_v8  ;;  %v90_v11 = vsub.f32 %v89_v6, %v74_v55  ;;  %v158_v12 = vsub.f32 %v410_v30, %v157_v5 }
 0x17f   :  { %v114_v13 = vsel %vm62_vm0, %v113_v9, 0.0 }
 0x180   :  { %115 = vadd.xlane.f32.xlu0 %v114_v13  ;;  %v91_v14 = vmul.f32 %v90_v11, %v86_v10  ;;  %v159_v16 = vsub.f32 %v158_v12, %v74_v55 }
 0x182   :  { %v92_v17 = vsel %vm62_vm0, %v91_v14, 0.0  ;;  %v160_v18 = vmul.f32 %v159_v16, %v155_v15 }
 0x183   :  { %93 = vadd.xlane.f32.xlu1 %v92_v17 }
 0x184   :  { %v161_v19 = vsel %vm62_vm0, %v160_v18, 0.0 }
 0x185   :  { %162 = vadd.xlane.f32.xlu0 %v161_v19 }
 0x20b   :  { %v139_v22 = vpop.xlane.xlu1 %138 }
 0x20d   :  { %v116_v21 = vpop.xlane.xlu0 %115 }
 0x20e   :  { %v140_v23 = vadd.f32 %v139_v22, %v116_v21 }
 0x210   :  { %v94_v27 = vpop.xlane.xlu1 %93 }
 0x212   :  { %v163_v24 = vpop.xlane.xlu0 %162 }
 0x213   :  { %v164_v25 = vadd.f32 %v163_v24, %v140_v23 }
 0x215   :  { %v165_v26 = vmul.f32 0.8, %v164_v25 }
 0x217   :  { %v166_v29 = vadd.f32 %v165_v26, %v94_v27 }
 0x219   :  { %v175_v30 = vadd.f32 %v172_v28, %v166_v29 }
 0x21b   :  { %177 = vst.msk [vmem:[#allocation2] sm:$0xff] %vm56_vm1, %v175_v30 }
 0x222   :  { %v181_v31 = vld [vmem:[#allocation2] sm:$0xff] }
 0x223   :  { %v182_v32 = vsel %vm56_vm1, %v181_v31, 0.0 }
 0x224   :  { %183 = vadd.xlane.f32.xlu0 %v182_v32 }
 0x2b1   :  { %v184_v33 = vpop.xlane.xlu0 %183 }
 0x2b2   :  { %v185_v34 = vrot.slane %v184_v33, 4 }
 0x2b4   :  { %v186_v35 = vadd.f32 %v185_v34, %v184_v33 }
 0x2b6   :  { %v187_v36 = vrot.slane %v186_v35, 2 }
 0x2b8   :  { %v188_v37 = vadd.f32 %v187_v36, %v186_v35 }
 0x2ba   :  { %v189_v38 = vrot.slane %v188_v37, 1 }
 0x2bc   :  { %v190_v39 = vadd.f32 %v189_v38, %v188_v37 }
 0x2be   :  { %211 = vpush %v190_v39 }
 0x2ef   :  { %s212_s22 = spop %211 }
 0x2f0   :  { %s192_s23 = smul.f32 2.0, %s212_s22 }
 0x2f2   :  { %v193_v40 = vstv %s192_s23 }
 0x2f3   :  { %194 = vst [vmem:[#allocation9] sm:$0xff] %v193_v40 }
 0x2f4   :  { %325 = shalt.err (!%p322_p0)
}
 0x2f5   :  { %s326_s27 = scalar_lea.hbm %s442_s3, 128 }
 0x2f6   :  { %p327_p1 = scmp.ne.s32.totalorder %s442_s3, %s326_s27  ;;  %p330_p2 = scmp.lt.u32.totalorder %s326_s27, %s442_s3 }
 0x2f8   :  { %p332_p3 = pnand %p330_p2, %p327_p1 }
 0x2fa   :  { %335 = shalt.err (!%p332_p3)
}
 0x2fb   :  { %204 = dma.vmem_to_hbm [thread:$0]  %s202_s21, 128, %s442_s3, [#allocation5]  }
 0x2fc   :  { %340 = dma.done.wait [#allocation5], 128  }
 0x2fd   :  { %341 = vsyncadd [#allocation5], 4294967168 }
 0x2fe   :  { %208 = vsyncpa [#allocation4], 1 }
 0x2ff   :  { %209 = vsyncpa [#allocation7], 1 }
 0x300   :  { %210 = vsyncpa [#allocation5], 1 }

</bundles_post_ra>
